<compile_context>
chip_gen: v6e
topology: v6e:2x2x1
jax: 0.10.0
libtpu: 0.0.40
codegen_flags: <defaults>
</compile_context>

<pallas_src>
import jax
import jax.numpy as jnp
from jax.experimental import pallas as pl
from jax.experimental.pallas import tpu as pltpu

IN = 3     # input features of lin3
HID = 20   # hidden width of lin3


def cae_critic_kernel(x_ref, w1_ref, b1_ref, w2_ref, b2_ref, o_ref):
    x = x_ref[...]          # (3, TILE_B)  f32, batch on lanes
    w1 = w1_ref[...]        # (20, 3)      f32
    b1 = b1_ref[...]        # (20, 1)      f32
    w2 = w2_ref[...]        # (1, 20)      f32

    # ---- Layer 1: Linear(3, 20) on the MXU, ReLU on the VPU --------------
    h = jnp.dot(w1, x,
                preferred_element_type=jnp.float32,
                precision=jax.lax.Precision.HIGHEST) + b1        # (20, TILE_B)
    h = jnp.maximum(h, 0.0)

    # ---- Layer 2: Linear(20, 1) on the MXU --------------------------------
    out = jnp.dot(w2, h,
                  preferred_element_type=jnp.float32,
                  precision=jax.lax.Precision.HIGHEST) + b2_ref[0, 0]  # (1, TILE_B)
    o_ref[...] = out.astype(o_ref.dtype)


def cae_critic_forward_t(x_t, w1, b1, w2, b2, *, tile_b=16384):
    """Fast path: x_t already in (3, B) batch-on-lanes layout. Returns (1, B).

    Args (torch nn.Linear parameter layout):
      x_t: (3, B)   w1: (20, 3)  b1: (20,)  w2: (1, 20)  b2: (1,)
    """
    assert x_t.shape[0] == IN
    B = x_t.shape[1]
    dt = x_t.dtype

    x_c = x_t.astype(jnp.float32)                        # no-op for f32 input
    w1_c = w1.astype(jnp.float32)                        # (20, 3)
    b1_c = b1.reshape(HID, 1).astype(jnp.float32)        # (20, 1)
    w2_c = w2.reshape(1, HID).astype(jnp.float32)        # (1, 20)
    b2_c = b2.reshape(1, 1).astype(jnp.float32)          # (1, 1) scalar -> SMEM

    # Lane tile: big enough to amortize grid-step overhead, capped so large
    # batches keep >= 2 grid steps (v7x megacore), never larger than needed.
    max_tile = pl.cdiv(B, 128) * 128
    if B >= 4096:
        max_tile = pl.cdiv(B, 2 * 128) * 128             # guarantee >= 2 steps
    tile_b = max(128, min((int(tile_b) // 128) * 128, max_tile))

    grid = (pl.cdiv(B, tile_b),)   # ragged final block: reads padded, writes clipped

    out_t = pl.pallas_call(
        cae_critic_kernel,
        out_shape=jax.ShapeDtypeStruct((1, B), dt),
        grid=grid,
        in_specs=[
            # x tile: lane-dense (3, TILE_B), tiled along batch.
            pl.BlockSpec((IN, tile_b), lambda i: (0, i)),
            # Params: full-array blocks, constant index_map -> VMEM-resident.
            pl.BlockSpec((HID, IN), lambda i: (0, 0)),
            pl.BlockSpec((HID, 1), lambda i: (0, 0)),
            pl.BlockSpec((1, HID), lambda i: (0, 0)),
            # Scalar output bias in SMEM.
            pl.BlockSpec((1, 1), lambda i: (0, 0),
                         memory_space=pltpu.MemorySpace.SMEM),
        ],
        # Lane-dense output block (1, TILE_B): unmasked vector stores.
        out_specs=pl.BlockSpec((1, tile_b), lambda i: (0, i)),
        compiler_params=pltpu.CompilerParams(
            dimension_semantics=("parallel",)),
        cost_estimate=pl.CostEstimate(
            flops=B * (2 * IN * HID + 2 * HID),
            transcendentals=0,
            bytes_accessed=(B * (IN + 1)
                            + w1_c.size + b1_c.size + w2_c.size + 1) * 4,
        ),
    )(x_c, w1_c, b1_c, w2_c, b2_c)

    return out_t


def cae_critic_forward(x, w1, b1, w2, b2, *, tile_b=16384):
    """Torch-layout entry point: x (B, 3) -> (B, 1).

    NOTE: prefer cae_critic_forward_t and keep activations in (3, B) layout
    end-to-end; the x.T here is one extra XLA transpose pass over a tiny
    (B, 3) array and should be fused into the producer in a real pipeline.
    """
    out_t = cae_critic_forward_t(x.T, w1, b1, w2, b2, tile_b=tile_b)
    return out_t.T                                      # (B, 1)


def init_params(key):
    """Deterministic init mimicking torch.nn.Linear default (uniform +/- 1/sqrt(fan_in)).

    Returns weights in torch layout: w1 (20,3), b1 (20,), w2 (1,20), b2 (1,).
    """
    k1, k2, k3, k4 = jax.random.split(key, 4)
    bound1 = 1.0 / jnp.sqrt(3.0)
    w1 = jax.random.uniform(k1, (HID, IN), jnp.float32, -bound1, bound1)
    b1 = jax.random.uniform(k2, (HID,), jnp.float32, -bound1, bound1)
    bound2 = 1.0 / jnp.sqrt(20.0)
    w2 = jax.random.uniform(k3, (1, HID), jnp.float32, -bound2, bound2)
    b2 = jax.random.uniform(k4, (1,), jnp.float32, -bound2, bound2)
    return w1, b1, w2, b2


if __name__ == "__main__":
    key = jax.random.PRNGKey(0)
    kx, kx2, kp = jax.random.split(key, 3)
    w1, b1, w2, b2 = init_params(kp)

    def ref_fn(x):
        # pure-JAX reference (torch Linear semantics), full f32 precision
        h = jnp.maximum(
            jnp.dot(x, w1.T, precision=jax.lax.Precision.HIGHEST) + b1[None, :],
            0.0)
        return jnp.dot(h, w2.T, precision=jax.lax.Precision.HIGHEST) + b2[None, :]

    # Small batch: single (ragged) lane tile.
    B = 8
    x = jax.random.normal(kx, (B, IN), jnp.float32)
    out = jax.block_until_ready(cae_critic_forward(x, w1, b1, w2, b2))
    assert out.shape == (B, 1)
    assert jnp.allclose(out, ref_fn(x), atol=1e-5), "mismatch vs reference (B=8)"

    # Batch that is not a multiple of 128 and spans multiple grid steps
    # (exercises the un-padded ragged-final-block path).
    B2 = 300
    x2 = jax.random.normal(kx2, (B2, IN), jnp.float32)
    out2 = jax.block_until_ready(
        cae_critic_forward(x2, w1, b1, w2, b2, tile_b=128))
    assert out2.shape == (B2, 1)
    assert jnp.allclose(out2, ref_fn(x2), atol=1e-5), "mismatch vs reference (B=300)"

    print("KERNEL_OK")
</pallas_src>

<mosaic_0001>
module attributes {stable_mosaic.version = 11 : i64} {
  func.func @cae_critic_kernel(%arg0: i32, %arg1: memref<3x128xf32, #tpu.memory_space<vmem>>, %arg2: memref<20x3xf32, #tpu.memory_space<vmem>>, %arg3: memref<20x1xf32, #tpu.memory_space<vmem>>, %arg4: memref<1x20xf32, #tpu.memory_space<vmem>>, %arg5: memref<1x1xf32, #tpu.memory_space<smem>>, %arg6: memref<1x128xf32, #tpu.memory_space<vmem>>) attributes {dimension_semantics = [#tpu.dimension_semantics<parallel>], iteration_bounds = array<i64: 1>, scalar_prefetch = 0 : i64, scratch_operands = 0 : i64, tpu.core_type = #tpu.core_type<tc>, window_params = [{transform_indices = @transform_0, window_bounds = array<i64: 3, 128>}, {pipeline_mode = #tpu.pipeline_mode<synchronous>, transform_indices = @transform_1, window_bounds = array<i64: 20, 3>}, {pipeline_mode = #tpu.pipeline_mode<synchronous>, transform_indices = @transform_2, window_bounds = array<i64: 20, 1>}, {pipeline_mode = #tpu.pipeline_mode<synchronous>, transform_indices = @transform_3, window_bounds = array<i64: 1, 20>}, {transform_indices = @transform_4, window_bounds = array<i64: 1, 1>}, {transform_indices = @transform_5, window_bounds = array<i64: 1, 128>}]} {
    %c0 = arith.constant 0 : index
    %c0_0 = arith.constant 0 : index
    %0 = vector.load %arg1[%c0, %c0_0] : memref<3x128xf32, #tpu.memory_space<vmem>>, vector<3x128xf32>
    %c0_1 = arith.constant 0 : index
    %c0_2 = arith.constant 0 : index
    %1 = vector.load %arg2[%c0_1, %c0_2] : memref<20x3xf32, #tpu.memory_space<vmem>>, vector<20x3xf32>
    %c0_3 = arith.constant 0 : index
    %c0_4 = arith.constant 0 : index
    %2 = vector.load %arg3[%c0_3, %c0_4] : memref<20x1xf32, #tpu.memory_space<vmem>>, vector<20x1xf32>
    %c0_5 = arith.constant 0 : index
    %c0_6 = arith.constant 0 : index
    %3 = vector.load %arg4[%c0_5, %c0_6] : memref<1x20xf32, #tpu.memory_space<vmem>>, vector<1x20xf32>
    %cst = arith.constant dense<0.000000e+00> : vector<20x128xf32>
    %4 = tpu.matmul %1, %0, %cst {dimension_numbers = #tpu.dot_dimension_numbers<[1], [0], [0], [1], [0, 0, 1, 1], [], []>, precision = #tpu.contract_precision<fp32>} : vector<20x3xf32>, vector<3x128xf32>, vector<20x128xf32> -> vector<20x128xf32>
    %5 = vector.broadcast %2 : vector<20x1xf32> to vector<20x128xf32>
    %6 = arith.addf %4, %5 : vector<20x128xf32>
    %cst_7 = arith.constant 0.000000e+00 : f32
    %7 = vector.broadcast %cst_7 : f32 to vector<20x128xf32>
    %8 = arith.maximumf %6, %7 : vector<20x128xf32>
    %cst_8 = arith.constant dense<0.000000e+00> : vector<1x128xf32>
    %9 = tpu.matmul %3, %8, %cst_8 {dimension_numbers = #tpu.dot_dimension_numbers<[1], [0], [0], [1], [0, 0, 1, 1], [], []>, precision = #tpu.contract_precision<fp32>} : vector<1x20xf32>, vector<20x128xf32>, vector<1x128xf32> -> vector<1x128xf32>
    %c0_9 = arith.constant 0 : index
    %c0_10 = arith.constant 0 : index
    %10 = memref.load %arg5[%c0_9, %c0_10] : memref<1x1xf32, #tpu.memory_space<smem>>
    %11 = vector.broadcast %10 : f32 to vector<1x128xf32>
    %12 = arith.addf %9, %11 : vector<1x128xf32>
    %c0_11 = arith.constant 0 : index
    %c0_12 = arith.constant 0 : index
    %13 = vector.load %arg6[%c0_11, %c0_12] : memref<1x128xf32, #tpu.memory_space<vmem>>, vector<1x128xf32>
    tpu.vector_store %arg6[%c0_11, %c0_12], %12 {strides = array<i32>} : memref<1x128xf32, #tpu.memory_space<vmem>>, vector<1x128xf32>,
    return
  }
  func.func @transform_0(%arg0: i32) -> (i32, i32) {
    %c0_i32 = arith.constant 0 : i32
    %c0_i32_0 = arith.constant 0 : i32
    return %c0_i32, %arg0 : i32, i32
  }
  func.func @transform_1(%arg0: i32) -> (i32, i32) {
    %c0_i32 = arith.constant 0 : i32
    %c0_i32_0 = arith.constant 0 : i32
    %c0_i32_1 = arith.constant 0 : i32
    return %c0_i32, %c0_i32_0 : i32, i32
  }
  func.func @transform_2(%arg0: i32) -> (i32, i32) {
    %c0_i32 = arith.constant 0 : i32
    %c0_i32_0 = arith.constant 0 : i32
    %c0_i32_1 = arith.constant 0 : i32
    return %c0_i32, %c0_i32_0 : i32, i32
  }
  func.func @transform_3(%arg0: i32) -> (i32, i32) {
    %c0_i32 = arith.constant 0 : i32
    %c0_i32_0 = arith.constant 0 : i32
    %c0_i32_1 = arith.constant 0 : i32
    return %c0_i32, %c0_i32_0 : i32, i32
  }
  func.func @transform_4(%arg0: i32) -> (i32, i32) {
    %c0_i32 = arith.constant 0 : i32
    %c0_i32_0 = arith.constant 0 : i32
    %c0_i32_1 = arith.constant 0 : i32
    return %c0_i32, %c0_i32_0 : i32, i32
  }
  func.func @transform_5(%arg0: i32) -> (i32, i32) {
    %c0_i32 = arith.constant 0 : i32
    %c0_i32_0 = arith.constant 0 : i32
    return %c0_i32, %arg0 : i32, i32
  }
}

</mosaic_0001>

<bundles_post_ra>
// kernel: tpu_custom_call.1
= control target key start
LH: loop header
LB: loop body
LE: loop exit
PB: predicated region body
PF: predicated region fallthrough
CT: control target
= control target key end

     0   :  { %vm55_vm0 = vcmask 1042432   ;;  %v1287_v2 = vmov 0.0   ;;  %vm1288_vm1 = vmmov 0   ;;  %vm45_vm2 = vcmask 23552   ;;  %s1452_s0 = inlined_call_operand.vmem [shape: f32[3,8], index: 0, kind: input, shape index: {}]   ;;  %s1453_s1 = inlined_call_operand.vmem [shape: f32[20,3], index: 1, kind: input, shape index: {}]   ;;  %s1454_s2 = inlined_call_operand.vmem [shape: f32[20,1], index: 2, kind: input, shape index: {}]   ;;  %s1455_s3 = inlined_call_operand.vmem [shape: f32[1,20], index: 3, kind: input, shape index: {}]   ;;  %s1456_s4 = inlined_call_operand.<no memory space> [shape: f32[1,1], index: 4, kind: input, shape index: {}]   ;;  %s1457_s5 = inlined_call_operand.hbm [shape: f32[1,8], index: 5, kind: output, shape index: {}]  }
   0x1   :  { %v22_v0 = vld [vmem:[%s1452_s0] sm:$0x7]  ;;  %1139 = vmatprep.subr.mxu0 %v1287_v2  ;;  %1141 = vmatprep.mubr.msk.f32.mxu0 %vm1288_vm1, %v1287_v2  ;;  %v24_v4 = vld [vmem:[%s1453_s1 + $0x8] sm:$0xff]  ;;  %v25_v5 = vld [vmem:[%s1453_s1 + $0x10] sm:$0xf]  ;;  %v1289_v14 = vmov 0  }
   0x2   :  { %v23_v1 = vld [vmem:[%s1453_s1] sm:$0xff]  ;;  %v57_v3 = vsel %vm55_vm0, %v22_v0, 0  ;;  %1150 = vmatprep.subr.mxu1 %v1287_v2  ;;  %1152 = vmatprep.mubr.msk.f32.mxu1 %vm1288_vm1, %v1287_v2  ;;  %v50_v8 = vsel %vm45_vm2, %v24_v4, 0  ;;  %v53_v9 = vsel %vm45_vm2, %v25_v5, 0  ;;  %v28_v10 = vld [vmem:[%s1454_s2 + $0x10] sm:$0xf] }
   0x3   :  { %v90_v6 = vand.u32 4294901760, %v57_v3  ;;  %v47_v7 = vsel %vm45_vm2, %v23_v1, 0  ;;  %v1344_v12 = vand.u32 4294901760, %v50_v8  ;;  %v1346_v13 = vand.u32 4294901760, %v53_v9  ;;  %1264 = vset.pattern.permute.xlu1 %v1289_v14  ;;  %1263 = vset.pattern.permute.xlu0 %v1289_v14  ;;  %v26_v15 = vld [vmem:[%s1454_s2] sm:$0xff] }
   0x4   :  { %v1342_v11 = vand.u32 4294901760, %v47_v7  ;;  %42 = vperm.xlu0 %1263, %v28_v10  }
   0x5   :  { %1140 = vmatpush3.msra.mxu0 %v90_v6  ;;  %v187_v16 = vsub.f32 %v57_v3, %v90_v6 }
   0x6   :  { %11 = vsyncpa [#allocation4], 0  ;;  %v126_v17 = vsub.f32 %v47_v7, %v1342_v11  ;;  %v136_v18 = vsub.f32 %v50_v8, %v1344_v12  ;;  %1161 = vmatprep.subr.mxu0 %v1287_v2  ;;  %v146_v19 = vsub.f32 %v53_v9, %v1346_v13  ;;  %32 = vperm.xlu1 %1264, %v26_v15   ;;  %v27_v20 = vld [vmem:[%s1454_s2 + $0x8] sm:$0xff]  ;;  %v29_v0 = vld [vmem:[%s1455_s3] sm:$0x1]  ;;  %vm596_vm3 = vcmask 162816  }
   0x7   :  { %v188_v21 = vand.u32 4294901760, %v187_v16  ;;  %v598_v8 = vsel %vm596_vm3, %v29_v0, 0  ;;  %vm600_vm4 = vcmask 1043456   ;;  %s1290_s7 = smov [#allocation3]  }
   0x8   :  { %v127_v22 = vand.u32 4294901760, %v126_v17  ;;  %v137_v23 = vand.u32 4294901760, %v136_v18  ;;  %37 = vperm.xlu0 %1263, %v27_v20   ;;  %v147_v27 = vand.u32 4294901760, %v146_v19  ;;  %v1411_v15 = vand.u32 4294901760, %v598_v8  ;;  %s1083_s8 = sshll.u32 %s1290_s7, 4  ;;  %s1084_s8 = int_to_ptr.vmem [resolvable:$true] %s1083_s8 }
   0x9   :  { %v189_v24 = vsub.f32 %v187_v16, %v188_v21  ;;  %s1269_s9 = scalar_lea.vmem %s1084_s8, 32  ;;  %p1270_p1 = scmp.lt.s32.totalorder %s1084_s8, %s1084_s8 }
   0xa   :  { %v128_v25 = vsub.f32 %v126_v17, %v127_v22  ;;  %v138_v26 = vsub.f32 %v136_v18, %v137_v23  ;;  %v148_v31 = vsub.f32 %v146_v19, %v147_v27 }
   0xb   :  { %v190_v28 = vand.u32 4294901760, %v189_v24  ;;  %v1414_v24 = vsub.f32 %v598_v8, %v1411_v15 }
   0xc   :  { %v129_v29 = vand.u32 4294901760, %v128_v25  ;;  %v139_v30 = vand.u32 4294901760, %v138_v26  ;;  %v149_v32 = vand.u32 4294901760, %v148_v31 }
   0xd   :  { %1151 = vmatpush3.msra.mxu1 %v190_v28 }
   0xe   :  { %1142 = vmatmul.mubr.f32.vlgmr.msra.gmra.mxu0 %v129_v29  ;;  %1153 = vmatmul.mubr.f32.vlgmr.msra.gmra.mxu1 %v1342_v11 }
   0xf   :  { %1144 = vmatprep.mubr.msk.f32.mxu0 %vm1288_vm1, %v1287_v2  ;;  %1155 = vmatprep.mubr.msk.f32.mxu1 %vm1288_vm1, %v1287_v2 }
  0x10   :  { %1162 = vmatpush3.msra.mxu0 %v187_v16  ;;  %1172 = vmatprep.subr.mxu1 %v1287_v2 }
  0x11   :  { %1173 = vmatpush3.msra.mxu1 %v90_v6  ;;  %1183 = vmatprep.subr.mxu0 %v1287_v2 }
  0x12   :  { %1145 = vmatmul.mubr.f32.gmra.mxu0 %v139_v30  ;;  %1156 = vmatmul.mubr.f32.gmra.mxu1 %v1344_v12 }
  0x13   :  { %1147 = vmatprep.mubr.msk.f32.mxu0 %vm1288_vm1, %v1287_v2  ;;  %1158 = vmatprep.mubr.msk.f32.mxu1 %vm1288_vm1, %v1287_v2 }
  0x14   :  { %1194 = vmatprep.subr.mxu1 %v1287_v2 }
  0x16   :  { %1148 = vmatmul.mubr.f32.gmra.mxu0 %v149_v32  ;;  %1159 = vmatmul.mubr.f32.gmra.mxu1 %v1346_v13 }
  0x17   :  { %1163 = vmatprep.mubr.msk.f32.mxu0 %vm1288_vm1, %v1287_v2  ;;  %1174 = vmatprep.mubr.msk.f32.mxu1 %vm1288_vm1, %v1287_v2 }
  0x1a   :  { %1164 = vmatmul.mubr.f32.vlgmr.msra.gmra.mxu0 %v126_v17  ;;  %1175 = vmatmul.mubr.f32.vlgmr.msra.gmra.mxu1 %v127_v22 }
  0x1b   :  { %1166 = vmatprep.mubr.msk.f32.mxu0 %vm1288_vm1, %v1287_v2  ;;  %1177 = vmatprep.mubr.msk.f32.mxu1 %vm1288_vm1, %v1287_v2 }
  0x1c   :  { %1184 = vmatpush3.msra.mxu0 %v188_v21  ;;  %1195 = vmatpush3.msra.mxu1 %v90_v6 }
  0x1d   :  { %1205 = vmatprep.subr.mxu0 %v1287_v2  ;;  %1214 = vmatprep.subr.mxu1 %v1287_v2 }
  0x1e   :  { %1167 = vmatmul.mubr.f32.gmra.mxu0 %v136_v18  ;;  %1178 = vmatmul.mubr.f32.gmra.mxu1 %v137_v23 }
  0x1f   :  { %1169 = vmatprep.mubr.msk.f32.mxu0 %vm1288_vm1, %v1287_v2  ;;  %1180 = vmatprep.mubr.msk.f32.mxu1 %vm1288_vm1, %v1287_v2 }
  0x22   :  { %1170 = vmatmul.mubr.f32.gmra.mxu0 %v146_v19  ;;  %1181 = vmatmul.mubr.f32.gmra.mxu1 %v147_v27 }
  0x23   :  { %1185 = vmatprep.mubr.msk.f32.mxu0 %vm1288_vm1, %v1287_v2  ;;  %1196 = vmatprep.mubr.msk.f32.mxu1 %vm1288_vm1, %v1287_v2 }
  0x26   :  { %1186 = vmatmul.mubr.f32.vlgmr.msra.gmra.mxu0 %v1342_v11  ;;  %1197 = vmatmul.mubr.f32.vlgmr.msra.gmra.mxu1 %v1342_v11 }
  0x27   :  { %1188 = vmatprep.mubr.msk.f32.mxu0 %vm1288_vm1, %v1287_v2  ;;  %1199 = vmatprep.mubr.msk.f32.mxu1 %vm1288_vm1, %v1287_v2 }
  0x2a   :  { %1189 = vmatmul.mubr.f32.gmra.mxu0 %v1344_v12  ;;  %1200 = vmatmul.mubr.f32.gmra.mxu1 %v1344_v12 }
  0x2b   :  { %1191 = vmatprep.mubr.msk.f32.mxu0 %vm1288_vm1, %v1287_v2  ;;  %1202 = vmatprep.mubr.msk.f32.mxu1 %vm1288_vm1, %v1287_v2 }
  0x2e   :  { %1192 = vmatmul.mubr.f32.gmra.mxu0 %v1346_v13  ;;  %1203 = vmatmul.mubr.f32.gmra.mxu1 %v1346_v13 }
  0x2f   :  { %1211 = vmatprep.mubr.msk.f32.mxu0 %vm1288_vm1, %v1287_v2  ;;  %1220 = vmatprep.mubr.msk.f32.mxu1 %vm1288_vm1, %v1287_v2 }
  0x7f   :  { %v43_v41 = vpop.permute.xlu0 %42 }
  0x81   :  { %v33_v44 = vpop.permute.xlu1 %32 }
  0x83   :  { %v38_v50 = vpop.permute.xlu0 %37 }
  0xce   :  { %v131_v33 = vpop.f32.mrf.mxu0  ;;  %v227_v34 = vpop.f32.mrf.mxu1 }
  0xcf   :  { %v132_v49 = vadd.f32 %v131_v33, %v33_v44 }
  0xd0   :  { %v1143_v35 = vpop.f32.mrf.mxu0  ;;  %v1154_v36 = vpop.f32.mrf.mxu1 }
  0xd1   :  { %v228_v55 = vadd.f32 %v227_v34, %v132_v49  ;;  %v674_v34 = vand.u32 4294901760, %v1414_v24 }
  0xd2   :  { %v141_v37 = vpop.f32.mrf.mxu0  ;;  %v233_v38 = vpop.f32.mrf.mxu1 }
  0xd3   :  { %v142_v56 = vadd.f32 %v141_v37, %v38_v50 }
  0xd4   :  { %v1146_v39 = vpop.f32.mrf.mxu0  ;;  %v1157_v40 = vpop.f32.mrf.mxu1 }
  0xd5   :  { %v234_v62 = vadd.f32 %v233_v38, %v142_v56  ;;  %v675_v39 = vsub.f32 %v1414_v24, %v674_v34 }
  0xd6   :  { %v151_v42 = vpop.f32.mrf.mxu0  ;;  %v239_v43 = vpop.f32.mrf.mxu1 }
  0xd7   :  { %v152_v63 = vadd.f32 %v151_v42, %v43_v41  ;;  %v676_v44 = vand.u32 4294901760, %v675_v39 }
  0xd8   :  { %v1149_v45 = vpop.f32.mrf.mxu0  ;;  %v1160_v46 = vpop.f32.mrf.mxu1 }
  0xd9   :  { %v240_v9 = vadd.f32 %v239_v43, %v152_v63 }
  0xda   :  { %v313_v47 = vpop.f32.mrf.mxu0  ;;  %v401_v48 = vpop.f32.mrf.mxu1 }
  0xdb   :  { %v314_v59 = vadd.f32 %v313_v47, %v228_v55  ;;  %v595_v55 = vstv %s1456_s4  ;;  %s1265_s4 = scalar_lea.vmem %s1084_s8, 16 }
  0xdc   :  { %v1165_v51 = vpop.f32.mrf.mxu0  ;;  %v1176_v52 = vpop.f32.mrf.mxu1  ;;  %p1266_p0 = scmp.ne.s32.totalorder %s1084_s8, %s1265_s4  ;;  %p1271_p2 = scmp.lt.s32.totalorder %s1269_s9, %s1265_s4 }
  0xdd   :  { %v402_v4 = vadd.f32 %v401_v48, %v314_v59 }
  0xde   :  { %v320_v53 = vpop.f32.mrf.mxu0  ;;  %v409_v54 = vpop.f32.mrf.mxu1  ;;  %p1272_p3 = por %p1271_p2, %p1270_p1 }
  0xdf   :  { %v321_v5 = vadd.f32 %v320_v53, %v234_v62 }
  0xe0   :  { %v1168_v57 = vpop.f32.mrf.mxu0  ;;  %v1179_v58 = vpop.f32.mrf.mxu1  ;;  %p1273_p4 = pnand %p1272_p3, %p1266_p0 }
  0xe1   :  { %v410_v13 = vadd.f32 %v409_v54, %v321_v5 }
  0xe2   :  { %v327_v60 = vpop.f32.mrf.mxu0  ;;  %v417_v61 = vpop.f32.mrf.mxu1 }
  0xe3   :  { %v328_v14 = vadd.f32 %v327_v60, %v240_v9 }
  0xe4   :  { %v1171_v1 = vpop.f32.mrf.mxu0  ;;  %v1182_v3 = vpop.f32.mrf.mxu1 }
  0xe5   :  { %v418_v22 = vadd.f32 %v417_v61, %v328_v14 }
  0xe6   :  { %v491_v6 = vpop.f32.mrf.mxu0  ;;  %v575_v7 = vpop.f32.mrf.mxu1 }
  0xe7   :  { %v492_v10 = vadd.f32 %v491_v6, %v402_v4 }
  0xe8   :  { %v1187_v11 = vpop.f32.mrf.mxu0  ;;  %v1198_v12 = vpop.f32.mrf.mxu1 }
  0xe9   :  { %v576_v16 = vadd.f32 %v575_v7, %v492_v10 }
  0xea   :  { %v497_v17 = vpop.f32.mrf.mxu0  ;;  %v581_v18 = vpop.f32.mrf.mxu1 }
  0xeb   :  { %v498_v19 = vadd.f32 %v497_v17, %v410_v13  ;;  %v591_v25 = vmax.f32 %v576_v16, 0.0 }
  0xec   :  { %v1190_v20 = vpop.f32.mrf.mxu0  ;;  %v1201_v21 = vpop.f32.mrf.mxu1 }
  0xed   :  { %v582_v23 = vadd.f32 %v581_v18, %v498_v19  ;;  %v637_v35 = vand.u32 4294901760, %v591_v25 }
  0xee   :  { %v503_v26 = vpop.f32.mrf.mxu0  ;;  %v587_v27 = vpop.f32.mrf.mxu1 }
  0xef   :  { %v592_v28 = vmax.f32 %v582_v23, 0.0  ;;  %v504_v29 = vadd.f32 %v503_v26, %v418_v22  ;;  %v724_v40 = vsub.f32 %v591_v25, %v637_v35 }
  0xf0   :  { %v1193_v30 = vpop.f32.mrf.mxu0  ;;  %v1204_v31 = vpop.f32.mrf.mxu1 }
  0xf1   :  { %v634_v32 = vand.u32 4294901760, %v592_v28  ;;  %v588_v33 = vadd.f32 %v587_v27, %v504_v29  ;;  %v725_v45 = vand.u32 4294901760, %v724_v40 }
  0xf3   :  { %v593_v36 = vmax.f32 %v588_v33, 0.0  ;;  %v717_v37 = vsub.f32 %v592_v28, %v634_v32  ;;  %v726_v49 = vsub.f32 %v724_v40, %v725_v45 }
  0xf5   :  { %v602_v38 = vsel %vm600_vm4, %v593_v36, 0  ;;  %v718_v42 = vand.u32 4294901760, %v717_v37  ;;  %v727_v52 = vand.u32 4294901760, %v726_v49 }
  0xf6   :  { %v631_v41 = vand.u32 4294901760, %v602_v38 }
  0xf7   :  { %v719_v47 = vsub.f32 %v717_v37, %v718_v42 }
  0xf8   :  { %v710_v43 = vsub.f32 %v602_v38, %v631_v41  ;;  %1206 = vmatpush3.msra.mxu0 %v631_v41 }
  0xf9   :  { %1207 = vmatprep.subr.mxu0 %v1287_v2  ;;  %v720_v51 = vand.u32 4294901760, %v719_v47 }
  0xfa   :  { %v711_v46 = vand.u32 4294901760, %v710_v43  ;;  %1208 = vmatpush3.msra.mxu0 %v634_v32 }
  0xfb   :  { %1209 = vmatprep.subr.mxu0 %v1287_v2 }
  0xfc   :  { %1210 = vmatpush3.msra.mxu0 %v637_v35  ;;  %v712_v48 = vsub.f32 %v710_v43, %v711_v46 }
  0xfd   :  { %1223 = vmatprep.subr.mxu0 %v1287_v2  ;;  %1212 = vmatmul.mubr.f32.vlgmr.msra.gmra.mxu0 %v676_v44 }
  0xfe   :  { %1224 = vmatpush3.msra.mxu0 %v710_v43  ;;  %v713_v50 = vand.u32 4294901760, %v712_v48  ;;  %1229 = vmatprep.mubr.msk.f32.mxu0 %vm1288_vm1, %v1287_v2 }
  0xff   :  { %1225 = vmatprep.subr.mxu0 %v1287_v2 }
 0x100   :  { %1215 = vmatpush3.msra.mxu1 %v713_v50  ;;  %1226 = vmatpush3.msra.mxu0 %v717_v37 }
 0x101   :  { %1216 = vmatprep.subr.mxu1 %v1287_v2  ;;  %1227 = vmatprep.subr.mxu0 %v1287_v2 }
 0x102   :  { %1217 = vmatpush3.msra.mxu1 %v720_v51  ;;  %1228 = vmatpush3.msra.mxu0 %v724_v40 }
 0x103   :  { %1218 = vmatprep.subr.mxu1 %v1287_v2  ;;  %1241 = vmatprep.subr.mxu0 %v1287_v2 }
 0x104   :  { %1219 = vmatpush3.msra.mxu1 %v727_v52  ;;  %1230 = vmatmul.mubr.f32.vlgmr.msra.gmra.mxu0 %v1414_v24 }
 0x105   :  { %1242 = vmatpush3.msra.mxu0 %v711_v46  ;;  %1232 = vmatprep.subr.mxu1 %v1287_v2 }
 0x106   :  { %1243 = vmatprep.subr.mxu0 %v1287_v2  ;;  %1221 = vmatmul.mubr.f32.vlgmr.msra.gmra.mxu1 %v1411_v15 }
 0x107   :  { %1233 = vmatpush3.msra.mxu1 %v631_v41  ;;  %1244 = vmatpush3.msra.mxu0 %v718_v42 }
 0x108   :  { %1234 = vmatprep.subr.mxu1 %v1287_v2  ;;  %1245 = vmatprep.subr.mxu0 %v1287_v2 }
 0x109   :  { %1235 = vmatpush3.msra.mxu1 %v634_v32  ;;  %1246 = vmatpush3.msra.mxu0 %v725_v45 }
 0x10a   :  { %1236 = vmatprep.subr.mxu1 %v1287_v2  ;;  %1238 = vmatprep.mubr.msk.f32.mxu1 %vm1288_vm1, %v1287_v2 }
 0x10b   :  { %1237 = vmatpush3.msra.mxu1 %v637_v35  ;;  %1247 = vmatprep.mubr.msk.f32.mxu0 %vm1288_vm1, %v1287_v2 }
 0x10c   :  { %1250 = vmatprep.subr.mxu1 %v1287_v2  ;;  %1239 = vmatmul.mubr.f32.vlgmr.msra.gmra.mxu1 %v674_v34 }
 0x10d   :  { %1251 = vmatpush3.msra.mxu1 %v631_v41  ;;  %1248 = vmatmul.mubr.f32.vlgmr.msra.gmra.mxu0 %v1411_v15 }
 0x10e   :  { %1252 = vmatprep.subr.mxu1 %v1287_v2  ;;  %1256 = vmatprep.mubr.msk.f32.mxu1 %vm1288_vm1, %v1287_v2 }
 0x10f   :  { %1253 = vmatpush3.msra.mxu1 %v634_v32 }
 0x110   :  { %1254 = vmatprep.subr.mxu1 %v1287_v2 }
 0x111   :  { %1255 = vmatpush3.msra.mxu1 %v637_v35 }
 0x112   :  { %1257 = vmatmul.mubr.f32.vlgmr.msra.gmra.mxu1 %v1411_v15 }
 0x1bd   :  { %v678_v53 = vpop.f32.mrf.mxu0 }
 0x1be   :  { %v679_v56 = vadd.f32 %v678_v53, %v595_v55 }
 0x1bf   :  { %v1213_v54 = vpop.f32.mrf.mxu0 }
 0x1c4   :  { %v842_v57 = vpop.f32.mrf.mxu0 }
 0x1c6   :  { %v764_v58 = vpop.f32.mrf.mxu1  ;;  %v1231_v59 = vpop.f32.mrf.mxu0 }
 0x1c7   :  { %v765_v60 = vadd.f32 %v764_v58, %v679_v56 }
 0x1c8   :  { %v1222_v61 = vpop.f32.mrf.mxu1 }
 0x1c9   :  { %v843_v62 = vadd.f32 %v842_v57, %v765_v60 }
 0x1cc   :  { %v918_v63 = vpop.f32.mrf.mxu1 }
 0x1cd   :  { %v919_v0 = vadd.f32 %v918_v63, %v843_v62  ;;  %v998_v1 = vpop.f32.mrf.mxu0 }
 0x1ce   :  { %v1240_v2 = vpop.f32.mrf.mxu1 }
 0x1cf   :  { %v1249_v3 = vpop.f32.mrf.mxu0  ;;  %v999_v4 = vadd.f32 %v998_v1, %v919_v0 }
 0x1d2   :  { %v1072_v5 = vpop.f32.mrf.mxu1 }
 0x1d3   :  { %v1073_v6 = vadd.f32 %v1072_v5, %v999_v4 }
 0x1d4   :  { %v1258_v7 = vpop.f32.mrf.mxu1 }
 0x1d5   :  { %1076 = vst [vmem:[#allocation3] sm:$0x1] %v1073_v6 }
 0x1d6   :  { %1276 = shalt.err (!%p1273_p4)
}
 0x1d7   :  { %1086 = dma.vmem_to_hbm [thread:$0]  %s1084_s8, 16, %s1457_s5, [#allocation4]  }
 0x1d8   :  { %1285 = dma.done.wait [#allocation4], 16  }
 0x1d9   :  { %1286 = vsyncadd [#allocation4], 4294967280 }
 0x1da   :  { %1090 = vsyncpa [#allocation4], 1 }

</bundles_post_ra>
